<compile_context>
chip_gen: v5e
topology: v5e:2x2
jax: 0.10.0
libtpu: 0.0.40
codegen_flags: <defaults>
</compile_context>

<pallas_src>
import jax
import jax.numpy as jnp
from jax.experimental import pallas as pl
from jax.experimental.pallas import tpu as pltpu

IN_FEATURES = 5
OUT_FEATURES = 10
N_PAD = 128        # lane-dense padded output width
MAX_TB = 512       # max batch-tile rows (f32) — safe for v7x 32 MiB scoped VMEM


def linear_kernel(x_ref, w_ref, b_ref, o_ref):
    # x_ref: (TB, IN), w_ref: (IN, N_PAD), b_ref: (1, N_PAD), o_ref: (TB, N_PAD)
    x = x_ref[...].astype(jnp.float32)
    w = w_ref[...].astype(jnp.float32)
    acc = jnp.broadcast_to(b_ref[...].astype(jnp.float32), o_ref.shape)
    # K=5: five VPU multiply-adds; avoids pushing a 5x10 matmul through the MXU.
    for k in range(IN_FEATURES):
        acc = acc + x[:, k:k + 1] * w[k:k + 1, :]
    o_ref[...] = acc.astype(o_ref.dtype)


def prepare_params(weight, bias):
    """One-time parameter prep (hoisted out of the per-call hot path).

    weight: (OUT, IN) PyTorch convention -> (IN, N_PAD) zero-padded W^T.
    bias:   (OUT,)                       -> (1, N_PAD) zero-padded.
    """
    out_f, in_f = weight.shape
    w_pad = jnp.zeros((in_f, N_PAD), dtype=weight.dtype).at[:, :out_f].set(weight.T)
    b_pad = jnp.zeros((1, N_PAD), dtype=bias.dtype).at[0, :out_f].set(bias)
    return w_pad, b_pad


def _round_up(n, m):
    return (n + m - 1) // m * m


def linear_forward(x, w_padded, b_padded):
    """x: (B, IN_FEATURES); w_padded/b_padded from prepare_params. Returns (B, OUT)."""
    B, in_f = x.shape
    tb = min(MAX_TB, _round_up(B, 8))          # sublane-aligned batch tile
    b_pad_rows = _round_up(B, tb)
    if b_pad_rows != B:
        x = jnp.pad(x, ((0, b_pad_rows - B), (0, 0)))
    grid = (b_pad_rows // tb,)

    cost = pl.CostEstimate(
        flops=2 * B * IN_FEATURES * OUT_FEATURES,
        transcendentals=0,
        bytes_accessed=4 * (b_pad_rows * in_f + w_padded.size
                            + b_padded.size + b_pad_rows * N_PAD),
    )

    out = pl.pallas_call(
        linear_kernel,
        out_shape=jax.ShapeDtypeStruct((b_pad_rows, N_PAD), x.dtype),
        grid=grid,
        in_specs=[
            pl.BlockSpec((tb, in_f), lambda i: (i, 0)),          # batch-tiled x
            pl.BlockSpec((IN_FEATURES, N_PAD), lambda i: (0, 0)),  # resident W^T
            pl.BlockSpec((1, N_PAD), lambda i: (0, 0)),            # resident bias
        ],
        out_specs=pl.BlockSpec((tb, N_PAD), lambda i: (i, 0)),
        compiler_params=pltpu.CompilerParams(
            dimension_semantics=("parallel",)),
        cost_estimate=cost,
    )(x, w_padded, b_padded)

    # Slice the lane-padded / batch-padded result back to the logical shape.
    return out[:B, :OUT_FEATURES]


if __name__ == "__main__":
    key = jax.random.PRNGKey(0)
    kx, kw, kb = jax.random.split(key, 3)

    B = 8
    x = jax.random.normal(kx, (B, IN_FEATURES), dtype=jnp.float32)

    # Deterministic parameter init (mimics nn.Linear's uniform(-1/sqrt(in), 1/sqrt(in))).
    bound = 1.0 / jnp.sqrt(jnp.float32(IN_FEATURES))
    weight = jax.random.uniform(kw, (OUT_FEATURES, IN_FEATURES),
                                minval=-bound, maxval=bound, dtype=jnp.float32)
    bias = jax.random.uniform(kb, (OUT_FEATURES,),
                              minval=-bound, maxval=bound, dtype=jnp.float32)

    # One-time param prep (kept out of the per-call hot path).
    w_padded, b_padded = prepare_params(weight, bias)

    out = linear_forward(x, w_padded, b_padded)
    jax.block_until_ready(out)

    # Verify against pure-JAX reference.
    ref = x @ weight.T + bias
    assert out.shape == (B, OUT_FEATURES)
    assert jnp.allclose(out, ref, atol=1e-5, rtol=1e-5)

    print("KERNEL_OK")
</pallas_src>

<mosaic_0001>
module attributes {stable_mosaic.version = 11 : i64} {
  func.func @linear_kernel(%arg0: i32, %arg1: memref<8x5xf32, #tpu.memory_space<vmem>>, %arg2: memref<5x128xf32, #tpu.memory_space<vmem>>, %arg3: memref<1x128xf32, #tpu.memory_space<vmem>>, %arg4: memref<8x128xf32, #tpu.memory_space<vmem>>) attributes {dimension_semantics = [#tpu.dimension_semantics<parallel>], iteration_bounds = array<i64: 1>, scalar_prefetch = 0 : i64, scratch_operands = 0 : i64, tpu.core_type = #tpu.core_type<tc>, window_params = [{transform_indices = @transform_0, window_bounds = array<i64: 8, 5>}, {pipeline_mode = #tpu.pipeline_mode<synchronous>, transform_indices = @transform_1, window_bounds = array<i64: 5, 128>}, {pipeline_mode = #tpu.pipeline_mode<synchronous>, transform_indices = @transform_2, window_bounds = array<i64: 1, 128>}, {transform_indices = @transform_3, window_bounds = array<i64: 8, 128>}]} {
    %c0 = arith.constant 0 : index
    %c0_0 = arith.constant 0 : index
    %0 = vector.load %arg1[%c0, %c0_0] : memref<8x5xf32, #tpu.memory_space<vmem>>, vector<8x5xf32>
    %c0_1 = arith.constant 0 : index
    %c0_2 = arith.constant 0 : index
    %1 = vector.load %arg2[%c0_1, %c0_2] : memref<5x128xf32, #tpu.memory_space<vmem>>, vector<5x128xf32>
    %c0_3 = arith.constant 0 : index
    %c0_4 = arith.constant 0 : index
    %2 = vector.load %arg3[%c0_3, %c0_4] : memref<1x128xf32, #tpu.memory_space<vmem>>, vector<1x128xf32>
    %3 = vector.shape_cast %2 : vector<1x128xf32> to vector<1x128xf32>
    %4 = vector.broadcast %3 : vector<1x128xf32> to vector<8x128xf32>
    %5 = vector.extract_strided_slice %0 {offsets = [0, 0], sizes = [8, 1], strides = [1, 1]} : vector<8x5xf32> to vector<8x1xf32>
    %6 = vector.extract_strided_slice %1 {offsets = [0, 0], sizes = [1, 128], strides = [1, 1]} : vector<5x128xf32> to vector<1x128xf32>
    %7 = vector.broadcast %5 : vector<8x1xf32> to vector<8x128xf32>
    %8 = vector.broadcast %6 : vector<1x128xf32> to vector<8x128xf32>
    %9 = arith.mulf %7, %8 : vector<8x128xf32>
    %10 = arith.addf %4, %9 : vector<8x128xf32>
    %11 = vector.extract_strided_slice %0 {offsets = [0, 1], sizes = [8, 1], strides = [1, 1]} : vector<8x5xf32> to vector<8x1xf32>
    %12 = vector.extract_strided_slice %1 {offsets = [1, 0], sizes = [1, 128], strides = [1, 1]} : vector<5x128xf32> to vector<1x128xf32>
    %13 = vector.broadcast %11 : vector<8x1xf32> to vector<8x128xf32>
    %14 = vector.broadcast %12 : vector<1x128xf32> to vector<8x128xf32>
    %15 = arith.mulf %13, %14 : vector<8x128xf32>
    %16 = arith.addf %10, %15 : vector<8x128xf32>
    %17 = vector.extract_strided_slice %0 {offsets = [0, 2], sizes = [8, 1], strides = [1, 1]} : vector<8x5xf32> to vector<8x1xf32>
    %18 = vector.extract_strided_slice %1 {offsets = [2, 0], sizes = [1, 128], strides = [1, 1]} : vector<5x128xf32> to vector<1x128xf32>
    %19 = vector.broadcast %17 : vector<8x1xf32> to vector<8x128xf32>
    %20 = vector.broadcast %18 : vector<1x128xf32> to vector<8x128xf32>
    %21 = arith.mulf %19, %20 : vector<8x128xf32>
    %22 = arith.addf %16, %21 : vector<8x128xf32>
    %23 = vector.extract_strided_slice %0 {offsets = [0, 3], sizes = [8, 1], strides = [1, 1]} : vector<8x5xf32> to vector<8x1xf32>
    %24 = vector.extract_strided_slice %1 {offsets = [3, 0], sizes = [1, 128], strides = [1, 1]} : vector<5x128xf32> to vector<1x128xf32>
    %25 = vector.broadcast %23 : vector<8x1xf32> to vector<8x128xf32>
    %26 = vector.broadcast %24 : vector<1x128xf32> to vector<8x128xf32>
    %27 = arith.mulf %25, %26 : vector<8x128xf32>
    %28 = arith.addf %22, %27 : vector<8x128xf32>
    %29 = vector.extract_strided_slice %0 {offsets = [0, 4], sizes = [8, 1], strides = [1, 1]} : vector<8x5xf32> to vector<8x1xf32>
    %30 = vector.extract_strided_slice %1 {offsets = [4, 0], sizes = [1, 128], strides = [1, 1]} : vector<5x128xf32> to vector<1x128xf32>
    %31 = vector.broadcast %29 : vector<8x1xf32> to vector<8x128xf32>
    %32 = vector.broadcast %30 : vector<1x128xf32> to vector<8x128xf32>
    %33 = arith.mulf %31, %32 : vector<8x128xf32>
    %34 = arith.addf %28, %33 : vector<8x128xf32>
    %c0_5 = arith.constant 0 : index
    %c0_6 = arith.constant 0 : index
    %35 = vector.load %arg4[%c0_5, %c0_6] : memref<8x128xf32, #tpu.memory_space<vmem>>, vector<8x128xf32>
    tpu.vector_store %arg4[%c0_5, %c0_6], %34 {strides = array<i32>} : memref<8x128xf32, #tpu.memory_space<vmem>>, vector<8x128xf32>,
    return
  }
  func.func @transform_0(%arg0: i32) -> (i32, i32) {
    %c0_i32 = arith.constant 0 : i32
    %c0_i32_0 = arith.constant 0 : i32
    return %arg0, %c0_i32 : i32, i32
  }
  func.func @transform_1(%arg0: i32) -> (i32, i32) {
    %c0_i32 = arith.constant 0 : i32
    %c0_i32_0 = arith.constant 0 : i32
    %c0_i32_1 = arith.constant 0 : i32
    return %c0_i32, %c0_i32_0 : i32, i32
  }
  func.func @transform_2(%arg0: i32) -> (i32, i32) {
    %c0_i32 = arith.constant 0 : i32
    %c0_i32_0 = arith.constant 0 : i32
    %c0_i32_1 = arith.constant 0 : i32
    return %c0_i32, %c0_i32_0 : i32, i32
  }
  func.func @transform_3(%arg0: i32) -> (i32, i32) {
    %c0_i32 = arith.constant 0 : i32
    %c0_i32_0 = arith.constant 0 : i32
    return %arg0, %c0_i32 : i32, i32
  }
}

</mosaic_0001>

<bundles_post_ra>
// kernel: tpu_custom_call.1
= control target key start
LH: loop header
LB: loop body
LE: loop exit
PB: predicated region body
PF: predicated region fallthrough
CT: control target
= control target key end

     0   :  { %8 = vsyncpa [#allocation3], 0  ;;  %s237_s0 = inlined_call_operand.hbm [shape: f32[8,5], index: 0, kind: input, shape index: {}]   ;;  %s238_s1 = inlined_call_operand.hbm [shape: f32[5,128], index: 1, kind: input, shape index: {}]   ;;  %s239_s2 = inlined_call_operand.vmem [shape: f32[1,128], index: 2, kind: input, shape index: {}]   ;;  %s240_s3 = inlined_call_operand.hbm [shape: f32[8,128], index: 3, kind: output, shape index: {}]  }
   0x1   :  { %9 = vsyncpa [#allocation6], 0 }
   0x2   :  { %10 = vsyncpa [#allocation4], 0  ;;  %s16_s14 = sshll.u32 %s237_s0, 4  ;;  %s197_s15 = smov [#allocation2]   ;;  %s17_s14 = int_to_ptr.hbm [resolvable:$true] %s16_s14 }
   0x3   :  { %s18_s16 = sshll.u32 %s197_s15, 4  ;;  %s27_s19 = sshll.u32 %s238_s1, 4  ;;  %s19_s16 = int_to_ptr.vmem [resolvable:$true] %s18_s16  ;;  %s28_s19 = int_to_ptr.hbm [resolvable:$true] %s27_s19 }
   0x4   :  { %21 = dma.hbm_to_vmem [thread:$0]  %s17_s14, 128, %s19_s16, [#allocation3]  }
   0x5   :  { %s198_s20 = smov [#allocation5]  }
   0x6   :  { %s29_s21 = sshll.u32 %s198_s20, 4  ;;  %s30_s21 = int_to_ptr.vmem [resolvable:$true] %s29_s21 }
   0x7   :  { %32 = dma.hbm_to_vmem [thread:$0]  %s28_s19, 128, %s30_s21, [#allocation6]  }
   0x8   :  { %191 = dma.done.wait [#allocation3], 128  }
   0x9   :  { %192 = vsyncadd [#allocation3], 4294967168 }
   0xa   :  { %193 = dma.done.wait [#allocation6], 128  }
   0xb   :  { %194 = vsyncadd [#allocation6], 4294967168  ;;  %v199_v0 = vmov 0   ;;  %v200_v1 = vmov 2   ;;  %v201_v2 = vmov 4   ;;  %v43_v3 = vld [vmem:[#allocation2] sm:$0xff] }
   0xc   :  { %112 = vset.pattern.permute.xlu0 %v199_v0  ;;  %114 = vset.pattern.permute.xlu1 %v200_v1  ;;  %v202_v4 = vmov 1   ;;  %v203_v5 = vmov 3   ;;  %v44_v6 = vld [vmem:[#allocation5] sm:$0x1f]  ;;  %v118_v10 = vld [vmem:[%s239_s2] ss:$0 sm:$0xff] }
   0xd   :  { %116 = vset.pattern.permute.xlu2 %v201_v2  ;;  %51 = vperm.xlu0 %112, %v43_v3   ;;  %v54_v9 = vperm.slane %v44_v6, 0  ;;  %v61_v12 = vperm.slane %v44_v6, 1  ;;  %v68_v13 = vperm.slane %v44_v6, 2  ;;  %v75_v14 = vperm.slane %v44_v6, 3  ;;  %s204_s22 = smov [#allocation7]   ;;  %s93_s2 = sshll.u32 %s240_s3, 4  ;;  %s94_s2 = int_to_ptr.hbm [resolvable:$true] %s93_s2 }
   0xe   :  { %65 = vperm.xlu1 %114, %v43_v3   ;;  %79 = vperm.xlu2 %116, %v43_v3   ;;  %v82_v19 = vperm.slane %v44_v6, 4  ;;  %s91_s23 = sshll.u32 %s204_s22, 4  ;;  %s92_s23 = int_to_ptr.vmem [resolvable:$true] %s91_s23 }
  0x15   :  { %113 = vset.pattern.permute.xlu0 %v202_v4 }
  0x16   :  { %115 = vset.pattern.permute.xlu1 %v203_v5  ;;  %58 = vperm.xlu0 %113, %v43_v3  }
  0x17   :  { %72 = vperm.xlu1 %115, %v43_v3  }
  0x1e   :  { %117 = vset.pattern.permute.xlu0 %v201_v2 }
  0x68   :  { %v80_v20 = vpop.permute.xlu2 %79 }
  0x69   :  { %v83_v25 = vmul.f32 %v82_v19, %v80_v20 }
  0x7f   :  { %v52_v7 = vpop.permute.xlu0 %51 }
  0x80   :  { %v66_v8 = vpop.permute.xlu1 %65  ;;  %v55_v11 = vmul.f32 %v54_v9, %v52_v7 }
  0x81   :  { %v69_v21 = vmul.f32 %v68_v13, %v66_v8 }
  0x82   :  { %v56_v17 = vadd.f32 %v118_v10, %v55_v11 }
  0x88   :  { %v59_v15 = vpop.permute.xlu0 %58 }
  0x89   :  { %v73_v16 = vpop.permute.xlu1 %72  ;;  %v62_v18 = vmul.f32 %v61_v12, %v59_v15 }
  0x8a   :  { %v76_v23 = vmul.f32 %v75_v14, %v73_v16 }
  0x8b   :  { %v63_v22 = vadd.f32 %v62_v18, %v56_v17 }
  0x8d   :  { %v70_v24 = vadd.f32 %v69_v21, %v63_v22 }
  0x8f   :  { %v77_v26 = vadd.f32 %v76_v23, %v70_v24 }
  0x91   :  { %v84_v27 = vadd.f32 %v83_v25, %v77_v26 }
  0x93   :  { %85 = vst [vmem:[#allocation7] sm:$0xff] %v84_v27 }
  0x94   :  { %96 = dma.vmem_to_hbm [thread:$0]  %s92_s23, 128, %s94_s2, [#allocation4]  }
  0x95   :  { %195 = dma.done.wait [#allocation4], 128  }
  0x96   :  { %196 = vsyncadd [#allocation4], 4294967168 }
  0x97   :  { %101 = vsyncpa [#allocation3], 1 }
  0x98   :  { %102 = vsyncpa [#allocation6], 1 }
  0x99   :  { %103 = vsyncpa [#allocation4], 1 }

</bundles_post_ra>
